<compile_context>
chip_gen: v5e
topology: v5e:2x2
jax: 0.10.0
libtpu: 0.0.40
codegen_flags: <defaults>
</compile_context>

<pallas_src>
import functools

import jax
import jax.numpy as jnp
from jax import lax
from jax.experimental import pallas as pl
from jax.experimental.pallas import tpu as pltpu

_EPS = 1e-12                  # torch.nn.functional.normalize default eps
_DOT_VMEM_BUDGET = 32 << 20   # double-buffered tile plan budget (safe on v7x's 64 MiB)
_PAIR_OUT_BUDGET = 8 << 20    # per-step pair output slab (x2 when double-buffered)
_VMEM_LIMIT = 48 << 20        # scoped VMEM limit handed to Mosaic (OK on v5e/v6e/v7x)


def _round_up(n, m):
    return ((n + m - 1) // m) * m


def _choose_tile(dim, candidates, small_full):
    """Largest candidate that evenly divides `dim`; `dim` itself if small enough;
    None if the caller should pad instead of falling back to a huge full-dim block."""
    for c in candidates:
        if c <= dim and dim % c == 0:
            return c
    if dim <= small_full:
        return dim
    return None


def _pad_to(a, shape):
    if tuple(a.shape) == tuple(shape):
        return a
    pads = [(0, t - s) for s, t in zip(a.shape, shape)]
    return jnp.pad(a, pads)


def _inv_l2(v):
    """Per-row 1 / max(||v||_2, eps).  Plain jnp: O(B*N*D), trivial next to the
    matmul, and it avoids two extra kernel launches + a masked-store output."""
    v32 = v.astype(jnp.float32)
    ssq = jnp.sum(v32 * v32, axis=-1)
    return lax.rsqrt(jnp.maximum(ssq, _EPS * _EPS))


# -----------------------------------------------------------------------------
# 'dot' matching: tiled (tm, tk) x (tn, tk)^T matmuls accumulated in f32.
# -----------------------------------------------------------------------------
_DOT_DNUMS = (((1,), (1,)), ((), ()))  # contract last dim of both operands (A @ B^T)
# NOTE(v5e): if a bundle dump shows a per-k vxpose of the y tile on the 4x128 MXU,
# pre-transpose y to (B, D, R) once in the wrapper; on v6e/v7x A @ B^T is native.


def _dot_kernel(x_ref, y_ref, *rest, normalize: bool, use_acc: bool):
    k = pl.program_id(3)
    nk = pl.num_programs(3)
    if normalize:
        ix_ref, iy_ref = rest[0], rest[1]
        rest = rest[2:]
    o_ref = rest[0]
    acc_ref = rest[1] if use_acc else None

    part = lax.dot_general(x_ref[0], y_ref[0], dimension_numbers=_DOT_DNUMS,
                           preferred_element_type=jnp.float32)

    if use_acc:
        @pl.when(k == 0)
        def _():
            acc_ref[...] = jnp.zeros_like(acc_ref)

        acc_ref[...] += part

        @pl.when(k == nk - 1)
        def _():
            r = acc_ref[...]
            if normalize:
                # Fold L2 normalization in as an output scaling (== normalize-then-matmul).
                r = r * ix_ref[0] * iy_ref[0]
            o_ref[0] = r.astype(o_ref.dtype)
    else:
        # float32 output: accumulate directly into the VMEM-resident output block
        # (its block index is constant along the k axis) -> no scratch, no copy.
        @pl.when(k == 0)
        def _():
            o_ref[0] = jnp.zeros_like(o_ref[0])

        o_ref[0] += part

        if normalize:
            @pl.when(k == nk - 1)
            def _():
                o_ref[0] = o_ref[0] * ix_ref[0] * iy_ref[0]


def matching_dot(x, y, normalize=False):
    B, L, D = x.shape
    _, R, _ = y.shape
    in_item = jnp.dtype(x.dtype).itemsize
    out_dtype = x.dtype
    out_item = jnp.dtype(out_dtype).itemsize
    use_acc = out_dtype != jnp.float32

    if normalize:
        inv_x = _inv_l2(x)[:, :, None]   # (B, L, 1) f32
        inv_y = _inv_l2(y)[:, None, :]   # (B, 1, R) f32 (pure reshape, no transpose)

    # ---- K (feature) axis ----
    tk = _choose_tile(D, (1024, 512, 256, 128), small_full=1024)
    Dp = D
    if tk is None:
        Dp = _round_up(D, 128)
        tk = next(c for c in (512, 256, 128) if Dp % c == 0)

    # ---- L axis ----
    tm = _choose_tile(L, (512, 256, 128), small_full=1024)
    Lp = L
    if tm is None:
        Lp = _round_up(L, 256)
        tm = 512 if Lp % 512 == 0 else 256

    # ---- R axis: keep the whole R block resident when it fits the VMEM budget,
    # so each x tile is DMA'd exactly once (no redundant x HBM traffic). ----
    def vmem_bytes(tn_):
        b = (2 * tm * tk * in_item        # x tile, double-buffered
             + 2 * tn_ * tk * in_item     # y tile, double-buffered
             + 2 * tm * tn_ * out_item)   # output tile, double-buffered
        if use_acc:
            b += tm * tn_ * 4
        if normalize:
            b += 2 * (tm + tn_) * 4
        return b

    Rp = R
    if vmem_bytes(R) <= _DOT_VMEM_BUDGET:
        tn = R
    else:
        tn = _choose_tile(R, (512, 256, 128), small_full=512)
        if tn is None:
            Rp = _round_up(R, 256)
            tn = 512 if (Rp % 512 == 0 and vmem_bytes(512) <= _DOT_VMEM_BUDGET) else 256

    # Keep at least 2 parallel grid steps so v7x's 2 TensorCores can both be used.
    if (B * (Lp // tm) * (Rp // tn) < 2 and tm % 2 == 0 and tm >= 256
            and Lp % (tm // 2) == 0):
        tm //= 2

    xp = _pad_to(x, (B, Lp, Dp))
    yp = _pad_to(y, (B, Rp, Dp))

    grid = (B, Lp // tm, Rp // tn, Dp // tk)
    in_specs = [pl.BlockSpec((1, tm, tk), lambda b, i, j, k: (b, i, k)),
                pl.BlockSpec((1, tn, tk), lambda b, i, j, k: (b, j, k))]
    args = [xp, yp]
    if normalize:
        in_specs += [pl.BlockSpec((1, tm, 1), lambda b, i, j, k: (b, i, 0)),
                     pl.BlockSpec((1, 1, tn), lambda b, i, j, k: (b, 0, j))]
        args += [_pad_to(inv_x, (B, Lp, 1)), _pad_to(inv_y, (B, 1, Rp))]

    scratch = [pltpu.VMEM((tm, tn), jnp.float32)] if use_acc else []

    cost = pl.CostEstimate(
        flops=2 * B * Lp * Rp * Dp,
        transcendentals=0,
        bytes_accessed=(B * Lp * Dp * in_item * (Rp // tn)    # x reread per R pass
                        + B * Rp * Dp * in_item * (Lp // tm)  # y reread per L pass
                        + B * Lp * Rp * out_item),
    )

    out = pl.pallas_call(
        functools.partial(_dot_kernel, normalize=normalize, use_acc=use_acc),
        out_shape=jax.ShapeDtypeStruct((B, Lp, Rp), out_dtype),
        grid=grid,
        in_specs=in_specs,
        out_specs=pl.BlockSpec((1, tm, tn), lambda b, i, j, k: (b, i, j)),
        scratch_shapes=scratch,
        compiler_params=pltpu.CompilerParams(
            dimension_semantics=("parallel", "parallel", "parallel", "arbitrary"),
            vmem_limit_bytes=_VMEM_LIMIT),
        cost_estimate=cost,
    )(*args)

    if (Lp, Rp) != (L, R):
        out = out[:, :L, :R]
    return out


# -----------------------------------------------------------------------------
# 'mul' / 'plus' / 'minus' / 'concat': tiled pairwise broadcast ops.
# Output is written as a lane-dense (tl, tr*out_d) slab (flattened last dims).
# -----------------------------------------------------------------------------
def _pair_kernel(x_ref, y_ref, o_ref, *, op):
    x = x_ref[0]                    # (tl, D)
    y = y_ref[0]                    # (tr, D)
    tl, D = x.shape
    tr = y.shape[0]
    xb = x[:, None, :]              # (tl, 1, D)
    yb = y[None, :, :]              # (1, tr, D)
    if op == "mul":
        r = xb * yb
    elif op == "plus":
        r = xb + yb
    elif op == "minus":
        r = xb - yb
    else:  # concat
        r = jnp.concatenate(
            (jnp.broadcast_to(xb, (tl, tr, D)), jnp.broadcast_to(yb, (tl, tr, D))),
            axis=-1)
    # Lane-dense store: one unmasked (tl, tr*out_d) slab per grid step.
    o_ref[0] = r.reshape(tl, -1)


def matching_pair(x, y, op):
    B, L, D = x.shape
    _, R, _ = y.shape
    out_d = 2 * D if op == "concat" else D
    itemsize = jnp.dtype(x.dtype).itemsize

    # L tiling: prefer 256-row tiles (bigger output slabs); pad large non-divisible L.
    tl = _choose_tile(L, (256, 128), small_full=512)
    Lp = L
    if tl is None:
        Lp = _round_up(L, 256)
        tl = 256

    # R tiling: lane-dense (tr*out_d multiple of 128) output slab within ~8 MiB.
    Rp = R
    if R > 256 and R % 128 != 0:
        Rp = _round_up(R, 128)
    tr = None
    for cand in (512, 256, 128, 64, 32, 16, 8):
        if (cand < Rp and Rp % cand == 0 and (cand * out_d) % 128 == 0
                and tl * cand * out_d * itemsize <= _PAIR_OUT_BUDGET):
            tr = cand
            break
    if tr is None:
        for cand in (128, 64, 32, 16, 8, 4, 2):
            if (cand < Rp and Rp % cand == 0
                    and tl * cand * out_d * itemsize <= _PAIR_OUT_BUDGET):
                tr = cand
                break
    if tr is None:
        tr = Rp

    xp = _pad_to(x, (B, Lp, D))
    yp = _pad_to(y, (B, Rp, D))

    flat = pl.pallas_call(
        functools.partial(_pair_kernel, op=op),
        out_shape=jax.ShapeDtypeStruct((B, Lp, Rp * out_d), x.dtype),
        grid=(B, Lp // tl, Rp // tr),
        in_specs=[
            pl.BlockSpec((1, tl, D), lambda b, i, j: (b, i, 0)),
            pl.BlockSpec((1, tr, D), lambda b, i, j: (b, j, 0)),
        ],
        out_specs=pl.BlockSpec((1, tl, tr * out_d), lambda b, i, j: (b, i, j)),
        compiler_params=pltpu.CompilerParams(
            dimension_semantics=("parallel", "parallel", "parallel"),
            vmem_limit_bytes=_VMEM_LIMIT),
    )(xp, yp)

    out = flat.reshape(B, Lp, Rp, out_d)
    if (Lp, Rp) != (L, R):
        out = out[:, :L, :R, :]
    return out


# -----------------------------------------------------------------------------
# 'exact': x (B, L) ids, y (B, R) ids; grid over (B, R tiles). Row counts for x
# are accumulated across the (last, "arbitrary") R axis, column counts for y are
# written per tile, so no full (L, R) mask is materialized.
# -----------------------------------------------------------------------------
def _exact_kernel(x_ref, y_ref, ox_ref, oy_ref):
    r = pl.program_id(1)
    x = x_ref[...]                                            # (1, L)
    y = y_ref[...]                                            # (1, tr)
    m = (x[:, :, None] == y[:, None, :]).astype(jnp.float32)  # (1, L, tr)

    @pl.when(r == 0)
    def _():
        ox_ref[...] = jnp.zeros_like(ox_ref)

    ox_ref[...] += jnp.sum(m, axis=2)   # accumulate over R tiles
    oy_ref[...] = jnp.sum(m, axis=1)    # one tile written per step


def matching_exact(x, y):
    B, L = x.shape
    _, R = y.shape
    # Tile R so the per-step (L, tr) f32 mask stays <= ~8 MiB.
    tr = R
    for cand in (2048, 1024, 512, 256, 128):
        if cand < R and R % cand == 0 and L * cand * 4 <= (8 << 20):
            tr = cand
            break
    # TODO(synk): if R has no suitable divisor and L*R is huge, pad R with a
    # non-matching sentinel id; with the tr=R fallback the kernel is correct but
    # materializes an (L, R) mask per batch.
    return pl.pallas_call(
        _exact_kernel,
        out_shape=(jax.ShapeDtypeStruct((B, L), jnp.float32),
                   jax.ShapeDtypeStruct((B, R), jnp.float32)),
        grid=(B, R // tr),
        in_specs=[pl.BlockSpec((1, L), lambda b, r: (b, 0)),
                  pl.BlockSpec((1, tr), lambda b, r: (b, r))],
        out_specs=[pl.BlockSpec((1, L), lambda b, r: (b, 0)),
                   pl.BlockSpec((1, tr), lambda b, r: (b, r))],
        compiler_params=pltpu.CompilerParams(
            dimension_semantics=("parallel", "arbitrary"),
            vmem_limit_bytes=_VMEM_LIMIT),
    )(x, y)


# -----------------------------------------------------------------------------
# Module-like wrapper mirroring the PyTorch API.
# -----------------------------------------------------------------------------
class Matching:
    _VALID = ["dot", "exact", "mul", "plus", "minus", "concat"]

    def __init__(self, normalize: bool = False, matching_type: str = "dot"):
        if matching_type not in self._VALID:
            raise ValueError(
                f"{matching_type} is not a valid matching type, {self._VALID} expected."
            )
        self._normalize = normalize
        self._matching_type = matching_type

    def __call__(self, x, y):
        if self._matching_type == "dot":
            return matching_dot(x, y, normalize=self._normalize)
        elif self._matching_type == "exact":
            return matching_exact(x, y)
        else:
            return matching_pair(x, y, self._matching_type)


# -----------------------------------------------------------------------------
# Pure-JAX references (correctness checking only).
# -----------------------------------------------------------------------------
def _ref_dot(x, y, normalize):
    if normalize:
        x = x / jnp.maximum(jnp.linalg.norm(x, axis=-1, keepdims=True), _EPS)
        y = y / jnp.maximum(jnp.linalg.norm(y, axis=-1, keepdims=True), _EPS)
    return jnp.einsum("bld,brd->blr", x, y)


def _ref_pair(x, y, op):
    xb = x[:, :, None, :]
    yb = y[:, None, :, :]
    if op == "mul":
        return xb * yb
    if op == "plus":
        return xb + yb
    if op == "minus":
        return xb - yb
    L, R = x.shape[1], y.shape[1]
    return jnp.concatenate(
        (jnp.broadcast_to(xb, (x.shape[0], L, R, x.shape[2])),
         jnp.broadcast_to(yb, (y.shape[0], L, R, y.shape[2]))),
        axis=-1)


def _ref_exact(x, y):
    m = (x[:, :, None] == y[:, None, :])
    return jnp.sum(m, axis=2).astype(jnp.float32), jnp.sum(m, axis=1).astype(jnp.float32)


if __name__ == "__main__":
    key = jax.random.PRNGKey(0)
    kx, ky, kxi, kyi = jax.random.split(key, 4)

    B, L, R, D = 2, 8, 16, 32
    x = jax.random.normal(kx, (B, L, D), dtype=jnp.float32)
    y = jax.random.normal(ky, (B, R, D), dtype=jnp.float32)

    # 'dot' (normalized and raw, f32 direct-output-accumulation path)
    out = jax.block_until_ready(Matching(normalize=True, matching_type="dot")(x, y))
    assert out.shape == (B, L, R)
    assert jnp.allclose(out, _ref_dot(x, y, True), atol=1e-4, rtol=1e-4)

    out = jax.block_until_ready(Matching(normalize=False, matching_type="dot")(x, y))
    assert jnp.allclose(out, _ref_dot(x, y, False), atol=1e-4, rtol=1e-4)

    # 'dot' with bf16 inputs (exercises the acc-scratch path)
    xb16 = x.astype(jnp.bfloat16)
    yb16 = y.astype(jnp.bfloat16)
    outb = jax.block_until_ready(Matching(matching_type="dot")(xb16, yb16))
    refb = _ref_dot(xb16.astype(jnp.float32), yb16.astype(jnp.float32), False)
    assert outb.dtype == jnp.bfloat16
    assert jnp.allclose(outb.astype(jnp.float32), refb, atol=2e-1, rtol=5e-2)

    # 'mul' / 'plus' / 'minus' / 'concat'
    for op in ("mul", "plus", "minus", "concat"):
        out = jax.block_until_ready(Matching(matching_type=op)(x, y))
        exp_d = 2 * D if op == "concat" else D
        assert out.shape == (B, L, R, exp_d)
        assert jnp.allclose(out, _ref_pair(x, y, op), atol=1e-6, rtol=1e-6)

    # 'exact' (integer token ids)
    xi = jax.random.randint(kxi, (B, L), 0, 5, dtype=jnp.int32)
    yi = jax.random.randint(kyi, (B, R), 0, 5, dtype=jnp.int32)
    ox, oy = jax.block_until_ready(Matching(matching_type="exact")(xi, yi))
    rx, ry = _ref_exact(xi, yi)
    assert ox.shape == (B, L) and oy.shape == (B, R)
    assert jnp.allclose(ox, rx) and jnp.allclose(oy, ry)

    print("KERNEL_OK")
</pallas_src>

<mosaic_0001>
module attributes {stable_mosaic.version = 11 : i64} {
  func.func @_dot_kernel(%arg0: i32, %arg1: i32, %arg2: i32, %arg3: i32, %arg4: memref<1x8x32xf32, #tpu.memory_space<vmem>>, %arg5: memref<1x16x32xf32, #tpu.memory_space<vmem>>, %arg6: memref<1x8x1xf32, #tpu.memory_space<vmem>>, %arg7: memref<1x1x16xf32, #tpu.memory_space<vmem>>, %arg8: memref<1x8x16xf32, #tpu.memory_space<vmem>>) attributes {dimension_semantics = [#tpu.dimension_semantics<parallel>, #tpu.dimension_semantics<parallel>, #tpu.dimension_semantics<parallel>, #tpu.dimension_semantics<arbitrary>], iteration_bounds = array<i64: 2, 1, 1, 1>, scalar_prefetch = 0 : i64, scratch_operands = 0 : i64, tpu.core_type = #tpu.core_type<tc>, window_params = [{transform_indices = @transform_0, window_bounds = array<i64: 1, 8, 32>}, {transform_indices = @transform_1, window_bounds = array<i64: 1, 16, 32>}, {transform_indices = @transform_2, window_bounds = array<i64: 1, 8, 1>}, {transform_indices = @transform_3, window_bounds = array<i64: 1, 1, 16>}, {transform_indices = @transform_4, window_bounds = array<i64: 1, 8, 16>}]} {
    %c0 = arith.constant 0 : index
    %c0_0 = arith.constant 0 : index
    %c0_1 = arith.constant 0 : index
    %0 = vector.load %arg4[%c0, %c0_0, %c0_1] : memref<1x8x32xf32, #tpu.memory_space<vmem>>, vector<1x8x32xf32>
    %1 = vector.shape_cast %0 : vector<1x8x32xf32> to vector<8x32xf32>
    %c0_2 = arith.constant 0 : index
    %c0_3 = arith.constant 0 : index
    %c0_4 = arith.constant 0 : index
    %2 = vector.load %arg5[%c0_2, %c0_3, %c0_4] : memref<1x16x32xf32, #tpu.memory_space<vmem>>, vector<1x16x32xf32>
    %3 = vector.shape_cast %2 : vector<1x16x32xf32> to vector<16x32xf32>
    %cst = arith.constant dense<0.000000e+00> : vector<8x16xf32>
    %4 = tpu.matmul %1, %3, %cst {dimension_numbers = #tpu.dot_dimension_numbers<[1], [1], [0], [0], [0, 0, 1, 0], [], []>} : vector<8x32xf32>, vector<16x32xf32>, vector<8x16xf32> -> vector<8x16xf32>
    %c0_i32 = arith.constant 0 : i32
    %5 = arith.cmpi eq, %arg3, %c0_i32 : i32
    %6 = arith.extui %5 : i1 to i32
    %c0_i32_5 = arith.constant 0 : i32
    %7 = arith.cmpi ne, %6, %c0_i32_5 : i32
    scf.if %7 {
      %cst_14 = arith.constant 0.000000e+00 : f32
      %17 = vector.broadcast %cst_14 : f32 to vector<8x16xf32>
      %c0_15 = arith.constant 0 : index
      %c0_16 = arith.constant 0 : index
      %c0_17 = arith.constant 0 : index
      %18 = vector.load %arg8[%c0_15, %c0_16, %c0_17] : memref<1x8x16xf32, #tpu.memory_space<vmem>>, vector<1x8x16xf32>
      %19 = vector.shape_cast %18 : vector<1x8x16xf32> to vector<8x16xf32>
      %20 = vector.shape_cast %17 : vector<8x16xf32> to vector<1x8x16xf32>
      tpu.vector_store %arg8[%c0_15, %c0_16, %c0_17], %20 {strides = array<i32>} : memref<1x8x16xf32, #tpu.memory_space<vmem>>, vector<1x8x16xf32>,
    } else {
    }
    %c0_6 = arith.constant 0 : index
    %c0_7 = arith.constant 0 : index
    %c0_8 = arith.constant 0 : index
    %8 = vector.load %arg8[%c0_6, %c0_7, %c0_8] : memref<1x8x16xf32, #tpu.memory_space<vmem>>, vector<1x8x16xf32>
    %9 = vector.shape_cast %8 : vector<1x8x16xf32> to vector<8x16xf32>
    %10 = arith.addf %9, %4 : vector<8x16xf32>
    %c0_9 = arith.constant 0 : index
    %c0_10 = arith.constant 0 : index
    %c0_11 = arith.constant 0 : index
    %11 = vector.load %arg8[%c0_9, %c0_10, %c0_11] : memref<1x8x16xf32, #tpu.memory_space<vmem>>, vector<1x8x16xf32>
    %12 = vector.shape_cast %11 : vector<1x8x16xf32> to vector<8x16xf32>
    %13 = vector.shape_cast %10 : vector<8x16xf32> to vector<1x8x16xf32>
    tpu.vector_store %arg8[%c0_9, %c0_10, %c0_11], %13 {strides = array<i32>} : memref<1x8x16xf32, #tpu.memory_space<vmem>>, vector<1x8x16xf32>,
    %c0_i32_12 = arith.constant 0 : i32
    %14 = arith.cmpi eq, %arg3, %c0_i32_12 : i32
    %15 = arith.extui %14 : i1 to i32
    %c0_i32_13 = arith.constant 0 : i32
    %16 = arith.cmpi ne, %15, %c0_i32_13 : i32
    scf.if %16 {
      %c0_14 = arith.constant 0 : index
      %c0_15 = arith.constant 0 : index
      %c0_16 = arith.constant 0 : index
      %17 = vector.load %arg8[%c0_14, %c0_15, %c0_16] : memref<1x8x16xf32, #tpu.memory_space<vmem>>, vector<1x8x16xf32>
      %18 = vector.shape_cast %17 : vector<1x8x16xf32> to vector<8x16xf32>
      %c0_17 = arith.constant 0 : index
      %c0_18 = arith.constant 0 : index
      %c0_19 = arith.constant 0 : index
      %19 = vector.load %arg6[%c0_17, %c0_18, %c0_19] : memref<1x8x1xf32, #tpu.memory_space<vmem>>, vector<1x8x1xf32>
      %20 = vector.shape_cast %19 : vector<1x8x1xf32> to vector<8x1xf32>
      %21 = vector.broadcast %20 : vector<8x1xf32> to vector<8x16xf32>
      %22 = arith.mulf %18, %21 : vector<8x16xf32>
      %c0_20 = arith.constant 0 : index
      %c0_21 = arith.constant 0 : index
      %c0_22 = arith.constant 0 : index
      %23 = vector.load %arg7[%c0_20, %c0_21, %c0_22] : memref<1x1x16xf32, #tpu.memory_space<vmem>>, vector<1x1x16xf32>
      %24 = vector.shape_cast %23 : vector<1x1x16xf32> to vector<1x16xf32>
      %25 = vector.broadcast %24 : vector<1x16xf32> to vector<8x16xf32>
      %26 = arith.mulf %22, %25 : vector<8x16xf32>
      %c0_23 = arith.constant 0 : index
      %c0_24 = arith.constant 0 : index
      %c0_25 = arith.constant 0 : index
      %27 = vector.load %arg8[%c0_23, %c0_24, %c0_25] : memref<1x8x16xf32, #tpu.memory_space<vmem>>, vector<1x8x16xf32>
      %28 = vector.shape_cast %27 : vector<1x8x16xf32> to vector<8x16xf32>
      %29 = vector.shape_cast %26 : vector<8x16xf32> to vector<1x8x16xf32>
      tpu.vector_store %arg8[%c0_23, %c0_24, %c0_25], %29 {strides = array<i32>} : memref<1x8x16xf32, #tpu.memory_space<vmem>>, vector<1x8x16xf32>,
    } else {
    }
    return
  }
  func.func @transform_0(%arg0: i32, %arg1: i32, %arg2: i32, %arg3: i32) -> (i32, i32, i32) {
    %c0_i32 = arith.constant 0 : i32
    return %arg0, %arg1, %arg3 : i32, i32, i32
  }
  func.func @transform_1(%arg0: i32, %arg1: i32, %arg2: i32, %arg3: i32) -> (i32, i32, i32) {
    %c0_i32 = arith.constant 0 : i32
    return %arg0, %arg2, %arg3 : i32, i32, i32
  }
  func.func @transform_2(%arg0: i32, %arg1: i32, %arg2: i32, %arg3: i32) -> (i32, i32, i32) {
    %c0_i32 = arith.constant 0 : i32
    %c0_i32_0 = arith.constant 0 : i32
    return %arg0, %arg1, %c0_i32 : i32, i32, i32
  }
  func.func @transform_3(%arg0: i32, %arg1: i32, %arg2: i32, %arg3: i32) -> (i32, i32, i32) {
    %c0_i32 = arith.constant 0 : i32
    %c0_i32_0 = arith.constant 0 : i32
    return %arg0, %c0_i32, %arg2 : i32, i32, i32
  }
  func.func @transform_4(%arg0: i32, %arg1: i32, %arg2: i32, %arg3: i32) -> (i32, i32, i32) {
    %c0_i32 = arith.constant 0 : i32
    return %arg0, %arg1, %arg2 : i32, i32, i32
  }
}

</mosaic_0001>

<bundles_post_ra>
// kernel: tpu_custom_call.1
= control target key start
LH: loop header
LB: loop body
LE: loop exit
PB: predicated region body
PF: predicated region fallthrough
CT: control target
= control target key end

     0   :  { %9 = vsyncpa [#allocation3], 0  ;;  %s927_s0 = inlined_call_operand.vmem [shape: f32[2,8,32], index: 0, kind: input, shape index: {}]   ;;  %s928_s1 = inlined_call_operand.hbm [shape: f32[2,16,32], index: 1, kind: input, shape index: {}]   ;;  %s929_s2 = inlined_call_operand.vmem [shape: f32[2,8,1], index: 2, kind: input, shape index: {}]   ;;  %s930_s3 = inlined_call_operand.vmem [shape: f32[2,1,16], index: 3, kind: input, shape index: {}]   ;;  %s931_s4 = inlined_call_operand.hbm [shape: f32[2,8,16], index: 4, kind: output, shape index: {}]  }
   0x1   :  { %11 = vsyncpa [#allocation3 + $0x1], 0 }
   0x2   :  { %12 = vsyncpa [#allocation4], 0 }
   0x3   :  { %14 = vsyncpa [#allocation4 + $0x1], 0  ;;  %s792_s15 = smov 0   ;;  %s794_s16 = smov 0  }
   0x4   :  { %s796_s17 = smov 0   ;;  %s798_s18 = smov 0  }
   0x5   :  { %s800_s19 = smov 0   ;;  %s802_s20 = smov 0  }
   0x6 LB: > { %s561_s21 = sadd.s32 4294967295, %s761_s20   ;;  %s562_s22 = sadd.s32 4294967294, %s761_s20   ;;  %s761_s20 = sphi %s802_s20, %s20_s20   ;;  %s757_s19 = sphi %s800_s19, %s940_s19   ;;  %s753_s18 = sphi %s798_s18, %s939_s18   ;;  %s749_s17 = sphi %s796_s17, %s938_s17   ;;  %s745_s16 = sphi %s794_s16, %s937_s16   ;;  %s741_s15 = sphi %s792_s15, %s936_s15  }
   0x7   : > { %s46_s23 = sadd.s32 1, %s757_s19  ;;  %s87_s24 = sadd.s32 1, %s749_s17 }
   0x8   : > { %p48_p0 = scmp.ge.s32.totalorder %s46_s23, 2  ;;  %p94_p1 = scmp.ne.s32.totalorder %s749_s17, %s745_s16 }
   0x9   : > { %p95_p2 = scmp.eq.s32.totalorder %s761_s20, 0  ;;  %p100_p3 = scmp.ne.s32.totalorder %s745_s16, %s741_s15 }
   0xa   : > { %s942_s23 = smov (%p48_p0, %s46_s23), 0  ;;  %p101_p5 = scmp.eq.s32.totalorder %s561_s21, 0 }
   0xb   : > { %p833_p4 = por %p95_p2, %p94_p1  ;;  %s80_s26 = ssub.s32 %s757_s19, %s942_s23 }
   0xc   : > { %p184_p6 = scmp.eq.s32.totalorder %s561_s21, 1  ;;  %p85_p7 = scmp.eq.s32.totalorder %s80_s26, 0 }
   0xd   : > { %p839_p8 = por %p101_p5, %p100_p3  ;;  %p190_p10 = scmp.eq.s32.totalorder %s562_s22, 1 }
   0xe   : > { %p843_p9 = por %p184_p6, %p94_p1  ;;  %p564_p12 = scmp.ge.s32.totalorder %s761_s20, 2 }
   0xf   : > { %s848_s29 = scalar_select %p85_p7, %s749_s17, %s87_s24  }
  0x10   : > { %p850_p11 = por %p190_p10, %p100_p3  ;;  %p593_p13 = scmp.lt.s32.totalorder %s761_s20, 2 }
  0x11   : > { %s223_s5 = sand.u32 1, %s749_s17   ;;  %s580_s7 = sshll.u32 %s757_s19, 4 }
  0x12   : > { %s565_s6 = sshll.u32 %s223_s5, 4  ;;  %s235_s10 = scalar_lea.hbm %s928_s1, %s580_s7 }
  0x13   : > { %s227_s11 = scalar_lea.vmem [#allocation2], %s565_s6  ;;  %s236_s13 = sshll.u32 %s235_s10, 4  ;;  %s237_s13 = int_to_ptr.hbm [resolvable:$true] %s236_s13 }
  0x14   : > { %s238_s12 = sshll.u32 %s227_s11, 4  ;;  %p586_p0 = pnand %p593_p13, %p833_p4  ;;  %s239_s12 = int_to_ptr.vmem [resolvable:$true] %s238_s12 }
  0x15   : > { %p568_p1 = scmp.ge.s32.totalorder %s761_s20, 1  ;;  %s224_s14 = scalar_lea.sflag [#allocation3], %s223_s5 }
  0x16   : > { %s763_s21 = smov 128   ;;  %s764_s22 = smov 8  }
  0x17   : > { %588 = dma.hbm_to_vmem [thread:$0]  (!%p586_p0), %s237_s13, 256, %s239_s12, %s224_s14, %s763_s21, %s763_s21, %s764_s22  }
  0x18   : > { %p265_p2 = scmp.lt.s32.totalorder %s761_s20, 3 }
  0x1a   : > { %p266_p3 = pnand %p568_p1, %p265_p2 }
  0x1b   : > { %s866_s24 = sand.u32 (!%p266_p3), 1, %s745_s16  }
  0x1c   : > { %269 = sbr.rel (%p266_p3) target bundleno = 185 (0xb9), region = 36  ;;  %s569_s26 = sshll.u32 (!%p266_p3), %s866_s24, 4 }
  0x1d   : > { %s272_s6 = scalar_lea.sflag (!%p266_p3), [#allocation3], %s866_s24  ;;  %s275_s7 = scalar_lea.vmem (!%p266_p3), [#allocation2], %s569_s26 }
  0x21   : > { %732 = dma.done.wait (%p839_p8), %s272_s6, 256  }
  0x22   : > { %734 = vsyncadd (%p839_p8), %s272_s6, 4294967040  ;;  %p324_p4 = scmp.lt.s32.totalorder %s753_s18, 1  ;;  %v765_v0 = vmov 0   ;;  %vm351_vm0 = vcmask 261120   ;;  %v350_v1 = vld [vmem:[%s275_s7 + $0x8] sm:$0xff]  ;;  %v349_v3 = vld [vmem:[%s275_s7] sm:$0xff] }
  0x23   : > { %647 = vset.pattern.permute.xlu0 %v765_v0  ;;  %573 = vmatpush.xpose.msk.msra.mxu0 %vm351_vm0, %v350_v1  ;;  %s570_s22 = sshll.u32 %s866_s24, 3  ;;  %vm385_vm1 = vcmask 130048   ;;  %v766_v5 = vmov 0.0   ;;  %s577_s6 = sshll.u32 %s753_s18, 3 }
  0x24   : > { %s325_s25 = scalar_select %p324_p4, %s753_s18, 1 }
  0x25   : > { %s323_s26 = scalar_lea.vmem [#allocation5], %s570_s22  ;;  %s421_s8 = scalar_lea.hbm %s931_s4, %s577_s6 }
  0x26   : > { %s571_s5 = sshll.u32 %s325_s25, 3  ;;  %s347_s21 = scalar_lea.vmem %s930_s3, %s325_s25  ;;  %386 = vst.msk [vmem:[%s323_s26] sm:$0xff] %vm385_vm1, %v766_v5 }
  0x27   : > { %s341_s10 = scalar_lea.vmem %s929_s2, %s571_s5  ;;  %s333_s12 = scalar_lea.vmem %s927_s0, %s571_s5  ;;  %574 = vmatpush.xpose.msk.msra.mxu0 %vm351_vm0, %v349_v3  ;;  %v648_v10 = vld [vmem:[%s347_s21] ss:$0 sm:$0xff] }
  0x28   : > { %v395_v2 = vld [vmem:[%s341_s10] sm:$0xff]  ;;  %s423_s25 = sshll.u32 %s323_s26, 4  ;;  %s425_s9 = sshll.u32 %s421_s8, 4  ;;  %s424_s25 = int_to_ptr.vmem [resolvable:$true] %s423_s25  ;;  %s426_s9 = int_to_ptr.hbm [resolvable:$true] %s425_s9 }
  0x29   : > { %398 = vperm.xlu0 %647, %v395_v2   ;;  %v348_v4 = vld [vmem:[%s333_s12] sm:$0xff]  ;;  %s409_s10 = scalar_lea.sflag [#allocation4], %s866_s24  ;;  %s693_s11 = sshra.s32 %s426_s9, 4  ;;  %s694_s11 = int_to_ptr.hbm [resolvable:$true] %s693_s11 }
  0x2a   : > { %575 = vmatmul.msk.f32.vlgmr.msra.gmra.mxu0 %vm351_vm0, %v348_v4  ;;  %s695_s18 = scalar_lea.hbm %s694_s11, 8  ;;  %s699_s13 = scalar_lea.hbm %s931_s4, 16 }
  0x2b   : > { %p696_p5 = scmp.ne.s32.totalorder %s694_s11, %s695_s18  ;;  %p700_p8 = scmp.lt.s32.totalorder %s694_s11, %s931_s4 }
  0x2c   : > { %p701_p10 = scmp.lt.s32.totalorder %s699_s13, %s695_s18 }
  0x2d   : > { %v387_v6 = vld [vmem:[%s323_s26] sm:$0xff]  ;;  %p697_p6 = pnand %p696_p5, %p843_p9 }
  0x2e   : > { %p702_p13 = por %p701_p10, %p700_p8 }
  0x2f   : > { %p698_p7 = pneg %p697_p6 }
  0x31   : > { %p703_p0 = pnand %p702_p13, %p698_p7 }
  0x9b   : > { %v399_v9 = vpop.permute.xlu0 %398 }
  0xa7   : > { %v378_v7 = vpop.f32.mrf.mxu0 }
  0xa8   : > { %v388_v8 = vadd.f32 %v387_v6, %v378_v7 }
  0xaa   : > { %390 = vst.msk [vmem:[%s323_s26] sm:$0xff] %vm385_vm1, %v388_v8 }
  0xb1   : > { %v394_v11 = vld [vmem:[%s323_s26] sm:$0xff] }
  0xb2   : > { %v401_v12 = vmul.f32 %v399_v9, %v394_v11 }
  0xb4   : > { %v406_v13 = vmul.f32 %v648_v10, %v401_v12 }
  0xb6   : > { %407 = vst.msk [vmem:[%s323_s26] sm:$0xff] %vm385_vm1, %v406_v13 }
  0xb7   : > { %706 = shalt.err (!%p703_p0)
}
  0xb8   : > { %583 = dma.vmem_to_hbm [thread:$0]  (%p843_p9), %s424_s25, 128, %s426_s9, %s409_s10  }
  0xb9 PF: > { %s437_s24 = sand.u32 1, %s741_s15   ;;  %p590_p1 = pnand %p564_p12, %p850_p11 }
  0xba   : > { %s438_s22 = scalar_lea.sflag [#allocation4], %s437_s24 }
  0xbb   : > { %p591_p2 = pneg %p590_p1 }
  0xbd   : > { %736 = dma.done.wait (%p591_p2), %s438_s22, 128  }
  0xbe   : > { %738 = vsyncadd (%p591_p2), %s438_s22, 4294967168  ;;  %s20_s20 = sadd.s32 1, %s761_s20   ;;  %s936_s15 = smov %s745_s16 }
  0xbf   : > { %p17_p3 = scmp.ge.s32.totalorder %s20_s20, 4   ;;  %s937_s16 = smov %s749_s17 }
  0xc0   : > { %s938_s17 = smov %s848_s29  ;;  %s939_s18 = smov %s757_s19 }
  0xc1   : > { %s940_s19 = smov %s942_s23  ;;  %19 = sbr.rel (!%p17_p3) target bundleno = 6 (0x6), region = 98 }
  0xc6   :  { %444 = vsyncpa [#allocation3], 1 }
  0xc7   :  { %446 = vsyncpa [#allocation3 + $0x1], 1 }
  0xc8   :  { %447 = vsyncpa [#allocation4], 1 }
  0xc9   :  { %449 = vsyncpa [#allocation4 + $0x1], 1 }

</bundles_post_ra>
